<compile_context>
chip_gen: v7x
topology: tpu7x:2x2x1
jax: 0.10.0
libtpu: 0.0.40
codegen_flags: <defaults>
</compile_context>

<pallas_src>
import jax
import jax.numpy as jnp
from jax import lax
from jax.experimental import pallas as pl
from jax.experimental.pallas import tpu as pltpu


_LANES = 128
_MAX_TIME_CHUNK = 4096


def _chip_kind():
    """Best-effort TPU generation detection: 'v5', 'v6', 'v7' or ''."""
    try:
        dk = jax.devices()[0].device_kind.lower()
    except Exception:
        return ""
    if "v7" in dk or "7x" in dk:
        return "v7"
    if "v6" in dk:
        return "v6"
    if "v5" in dk:
        return "v5"
    return ""


def _make_kernel(time_chunk: int, unroll: int, compute_dtype):
    def kernel(f_ref, z_ref, o_ref, h_carry):
        # f_ref, z_ref, o_ref : (time_chunk, r_block, 128) VMEM tiles
        # h_carry             : (r_block, 128) f32 scratch, persists across the
        #                       sequential time-chunk grid axis.

        @pl.when(pl.program_id(1) == 0)   # first time-chunk of this lane block
        def _():
            # prev_h = None in the torch code  <=>  prev_h = 0
            h_carry[...] = jnp.zeros_like(h_carry)

        def step(t, h_prev):
            f_t = f_ref[t].astype(compute_dtype)
            z_t = z_ref[t].astype(compute_dtype)
            # h = (1 - f) * z + f * h_prev, rewritten with 3 VALU ops.
            h = z_t + f_t * (h_prev.astype(compute_dtype) - z_t)
            o_ref[t] = h.astype(o_ref.dtype)
            return h.astype(jnp.float32)

        h_carry[...] = lax.fori_loop(
            0, time_chunk, step, h_carry[...], unroll=unroll)

    return kernel


def forget_mult(f, z):
    """QRNN forget-mult. f, z: (T, B, H). Returns (T, B, H) hidden states."""
    T, B, H = f.shape
    assert z.shape == (T, B, H)
    out_dtype = jnp.result_type(f.dtype, z.dtype)
    f = f.astype(out_dtype)
    z = z.astype(out_dtype)
    itemsize = jnp.dtype(out_dtype).itemsize
    chip = _chip_kind()

    # dtype-aware minimum sublane tile (f32: 8, bf16/f16: 16, int8/fp8: 32)
    sublane_min = {4: 8, 2: 16, 1: 32}.get(itemsize, 8)

    # ---- lane-dense layout: (T, B, H) -> (T, R, 128) -------------------------
    # Copy-free (pure reshape) whenever B*H is a multiple of 128; otherwise pad
    # only the lane dimension (no padding along T in either case).
    N = B * H
    R = pl.cdiv(N, _LANES)
    lane_padded = (R * _LANES != N)
    f2 = f.reshape(T, N)
    z2 = z.reshape(T, N)
    if lane_padded:
        pad = R * _LANES - N
        f2 = jnp.pad(f2, ((0, 0), (0, pad)))
        z2 = jnp.pad(z2, ((0, 0), (0, pad)))
    f3 = f2.reshape(T, R, _LANES)
    z3 = z2.reshape(T, R, _LANES)

    # ---- v7x: split the lane plane across both TensorCores -------------------
    # Only when the half-plane respects the dtype's sublane tile; on v5e/v6e a
    # split is pure overhead (two sequential passes), so keep one lane block.
    if chip == "v7" and R >= 2 * sublane_min and R % (2 * sublane_min) == 0:
        num_lane_blocks = 2
        dim_semantics = (pltpu.CORE_PARALLEL, pltpu.ARBITRARY)
    else:
        num_lane_blocks = 1
        dim_semantics = ("parallel", "arbitrary")
    r_block = R // num_lane_blocks

    # ---- per-chip VMEM budget -------------------------------------------------
    if chip in ("v5", "v6"):          # 128 MiB physical VMEM
        block_budget = 48 * 1024 * 1024
        vmem_limit = 96 * 1024 * 1024
    else:                             # v7x (64 MiB physical) / unknown: conservative
        block_budget = 16 * 1024 * 1024
        vmem_limit = 32 * 1024 * 1024

    # ---- time-chunk size from the VMEM budget ---------------------------------
    # 6 = (2 inputs + 1 output) x double-buffering. Prefer a chunk size that
    # divides T (no ragged tail); otherwise rely on Pallas masking the ragged
    # last chunk (OOB writebacks dropped, stale carry never consumed).
    bytes_per_step = 6 * r_block * _LANES * itemsize
    tc = max(1, block_budget // bytes_per_step)
    tc = int(min(tc, T, _MAX_TIME_CHUNK))
    if T % tc != 0:
        for cand in range(tc, max(tc // 2, 1) - 1, -1):
            if T % cand == 0:
                tc = cand
                break
    num_time_chunks = pl.cdiv(T, tc)

    # ---- compute precision ----------------------------------------------------
    # bf16 VPU exists on v6e/v7x; v5e (and unknown) upcast to f32.
    if out_dtype == jnp.bfloat16 and chip in ("v6", "v7"):
        compute_dtype = jnp.bfloat16
    else:
        compute_dtype = jnp.float32

    # ---- unroll: deep for tiny (latency-bound) planes, shallow for big ones ---
    if r_block <= 8:
        unroll = min(tc, 32)
    elif r_block <= 64:
        unroll = min(tc, 8)
    elif r_block < 256:
        unroll = min(tc, 4)
    else:
        unroll = min(tc, 2)

    block = (tc, r_block, _LANES)
    idx_map = lambda l, c: (c, l, 0)

    out = pl.pallas_call(
        _make_kernel(tc, unroll, compute_dtype),
        out_shape=jax.ShapeDtypeStruct((T, R, _LANES), out_dtype),
        grid_spec=pltpu.PrefetchScalarGridSpec(
            num_scalar_prefetch=0,
            grid=(num_lane_blocks, num_time_chunks),
            in_specs=[
                pl.BlockSpec(block, idx_map),
                pl.BlockSpec(block, idx_map),
            ],
            out_specs=pl.BlockSpec(block, idx_map),
            scratch_shapes=[pltpu.VMEM((r_block, _LANES), jnp.float32)],
        ),
        compiler_params=pltpu.CompilerParams(
            # Lane blocks are independent (core-sharded on v7x); the time axis
            # carries the recurrence and must run in order.
            dimension_semantics=dim_semantics,
            vmem_limit_bytes=vmem_limit,
        ),
    )(f3, z3)

    # Restore (T, B, H). Copy-free reshape when no lane padding was needed.
    if lane_padded:
        return out.reshape(T, R * _LANES)[:, :N].reshape(T, B, H)
    return out.reshape(T, B, H)


def _reference(f, z):
    """Pure-JAX reference mirroring the PyTorch loop."""
    def step(prev_h, fz):
        f_t, z_t = fz
        h = (1.0 - f_t) * z_t + f_t * prev_h
        return h, h

    init = jnp.zeros(f.shape[1:], dtype=jnp.float32)
    _, hs = lax.scan(step, init, (f.astype(jnp.float32), z.astype(jnp.float32)))
    return hs.astype(f.dtype)


if __name__ == "__main__":
    key = jax.random.PRNGKey(0)

    # Primary shape from the module spec: seq=8, batch=2, hidden=32.
    T, B, H = 8, 2, 32
    kf, kz, key = jax.random.split(key, 3)
    # f is a forget gate -> values in (0, 1), like sigmoid outputs
    f = jax.nn.sigmoid(jax.random.normal(kf, (T, B, H), dtype=jnp.float32))
    z = jax.random.normal(kz, (T, B, H), dtype=jnp.float32)

    out = jax.block_until_ready(forget_mult(f, z))
    ref = _reference(f, z)
    assert out.shape == (T, B, H)
    assert jnp.allclose(out, ref, atol=1e-5, rtol=1e-5)

    # Shape exercising the lane-padding path (odd T, B*H % 128 != 0).
    T2, B2, H2 = 13, 3, 20
    kf2, kz2, key = jax.random.split(key, 3)
    f_b = jax.nn.sigmoid(jax.random.normal(kf2, (T2, B2, H2), dtype=jnp.float32))
    z_b = jax.random.normal(kz2, (T2, B2, H2), dtype=jnp.float32)
    out_b = jax.block_until_ready(forget_mult(f_b, z_b))
    assert jnp.allclose(out_b, _reference(f_b, z_b), atol=1e-5, rtol=1e-5)

    # Shape exercising the copy-free (B*H % 128 == 0) path, multi time-chunk
    # pipelining and the ragged last time chunk (T=397 is prime).
    T3, B3, H3 = 397, 8, 1024
    kf3, kz3, _ = jax.random.split(key, 3)
    f_c = 0.9 * jax.nn.sigmoid(jax.random.normal(kf3, (T3, B3, H3), dtype=jnp.float32))
    z_c = jax.random.normal(kz3, (T3, B3, H3), dtype=jnp.float32)
    out_c = jax.block_until_ready(forget_mult(f_c, z_c))
    assert jnp.allclose(out_c, _reference(f_c, z_c), atol=1e-4, rtol=1e-4)

    print("KERNEL_OK")
</pallas_src>

<mosaic_0001>
module attributes {stable_mosaic.version = 11 : i64} {
  func.func @kernel(%arg0: i32, %arg1: i32, %arg2: memref<8x1x128xf32, #tpu.memory_space<vmem>>, %arg3: memref<8x1x128xf32, #tpu.memory_space<vmem>>, %arg4: memref<8x1x128xf32, #tpu.memory_space<vmem>>, %arg5: memref<1x128xf32, #tpu.memory_space<vmem>>) attributes {dimension_semantics = [#tpu.dimension_semantics<parallel>, #tpu.dimension_semantics<arbitrary>], iteration_bounds = array<i64: 1, 1>, scalar_prefetch = 0 : i64, scratch_operands = 1 : i64, tpu.core_type = #tpu.core_type<tc>, window_params = [{transform_indices = @transform_0, window_bounds = array<i64: 8, 1, 128>}, {transform_indices = @transform_1, window_bounds = array<i64: 8, 1, 128>}, {transform_indices = @transform_2, window_bounds = array<i64: 8, 1, 128>}]} {
    %c0_i32 = arith.constant 0 : i32
    %0 = arith.cmpi eq, %arg1, %c0_i32 : i32
    %1 = arith.extui %0 : i1 to i32
    %c0_i32_0 = arith.constant 0 : i32
    %2 = arith.cmpi ne, %1, %c0_i32_0 : i32
    scf.if %2 {
      %cst = arith.constant 0.000000e+00 : f32
      %109 = vector.broadcast %cst : f32 to vector<1x128xf32>
      %c0_53 = arith.constant 0 : index
      %c0_54 = arith.constant 0 : index
      %110 = vector.load %arg5[%c0_53, %c0_54] : memref<1x128xf32, #tpu.memory_space<vmem>>, vector<1x128xf32>
      tpu.vector_store %arg5[%c0_53, %c0_54], %109 {strides = array<i32>} : memref<1x128xf32, #tpu.memory_space<vmem>>, vector<1x128xf32>,
    } else {
    }
    %c0 = arith.constant 0 : index
    %c0_1 = arith.constant 0 : index
    %3 = vector.load %arg5[%c0, %c0_1] : memref<1x128xf32, #tpu.memory_space<vmem>>, vector<1x128xf32>
    %c0_i32_2 = arith.constant 0 : i32
    %4 = arith.index_cast %c0_i32_2 : i32 to index
    %c0_3 = arith.constant 0 : index
    %c0_4 = arith.constant 0 : index
    %5 = vector.load %arg2[%4, %c0_3, %c0_4] : memref<8x1x128xf32, #tpu.memory_space<vmem>>, vector<1x1x128xf32>
    %6 = vector.shape_cast %5 : vector<1x1x128xf32> to vector<1x128xf32>
    %7 = arith.index_cast %c0_i32_2 : i32 to index
    %c0_5 = arith.constant 0 : index
    %c0_6 = arith.constant 0 : index
    %8 = vector.load %arg3[%7, %c0_5, %c0_6] : memref<8x1x128xf32, #tpu.memory_space<vmem>>, vector<1x1x128xf32>
    %9 = vector.shape_cast %8 : vector<1x1x128xf32> to vector<1x128xf32>
    %10 = arith.subf %3, %9 : vector<1x128xf32>
    %11 = arith.mulf %6, %10 : vector<1x128xf32>
    %12 = arith.addf %9, %11 : vector<1x128xf32>
    %13 = arith.index_cast %c0_i32_2 : i32 to index
    %c0_7 = arith.constant 0 : index
    %c0_8 = arith.constant 0 : index
    %14 = vector.load %arg4[%13, %c0_7, %c0_8] : memref<8x1x128xf32, #tpu.memory_space<vmem>>, vector<1x1x128xf32>
    %15 = vector.shape_cast %14 : vector<1x1x128xf32> to vector<1x128xf32>
    %16 = vector.shape_cast %12 : vector<1x128xf32> to vector<1x1x128xf32>
    tpu.vector_store %arg4[%13, %c0_7, %c0_8], %16 {strides = array<i32>} : memref<8x1x128xf32, #tpu.memory_space<vmem>>, vector<1x1x128xf32>,
    %c1_i32 = arith.constant 1 : i32
    %17 = arith.index_cast %c1_i32 : i32 to index
    %c0_9 = arith.constant 0 : index
    %c0_10 = arith.constant 0 : index
    %18 = vector.load %arg2[%17, %c0_9, %c0_10] : memref<8x1x128xf32, #tpu.memory_space<vmem>>, vector<1x1x128xf32>
    %19 = vector.shape_cast %18 : vector<1x1x128xf32> to vector<1x128xf32>
    %20 = arith.index_cast %c1_i32 : i32 to index
    %c0_11 = arith.constant 0 : index
    %c0_12 = arith.constant 0 : index
    %21 = vector.load %arg3[%20, %c0_11, %c0_12] : memref<8x1x128xf32, #tpu.memory_space<vmem>>, vector<1x1x128xf32>
    %22 = vector.shape_cast %21 : vector<1x1x128xf32> to vector<1x128xf32>
    %23 = arith.subf %12, %22 : vector<1x128xf32>
    %24 = arith.mulf %19, %23 : vector<1x128xf32>
    %25 = arith.addf %22, %24 : vector<1x128xf32>
    %26 = arith.index_cast %c1_i32 : i32 to index
    %c0_13 = arith.constant 0 : index
    %c0_14 = arith.constant 0 : index
    %27 = vector.load %arg4[%26, %c0_13, %c0_14] : memref<8x1x128xf32, #tpu.memory_space<vmem>>, vector<1x1x128xf32>
    %28 = vector.shape_cast %27 : vector<1x1x128xf32> to vector<1x128xf32>
    %29 = vector.shape_cast %25 : vector<1x128xf32> to vector<1x1x128xf32>
    tpu.vector_store %arg4[%26, %c0_13, %c0_14], %29 {strides = array<i32>} : memref<8x1x128xf32, #tpu.memory_space<vmem>>, vector<1x1x128xf32>,
    %c2_i32 = arith.constant 2 : i32
    %30 = arith.index_cast %c2_i32 : i32 to index
    %c0_15 = arith.constant 0 : index
    %c0_16 = arith.constant 0 : index
    %31 = vector.load %arg2[%30, %c0_15, %c0_16] : memref<8x1x128xf32, #tpu.memory_space<vmem>>, vector<1x1x128xf32>
    %32 = vector.shape_cast %31 : vector<1x1x128xf32> to vector<1x128xf32>
    %33 = arith.index_cast %c2_i32 : i32 to index
    %c0_17 = arith.constant 0 : index
    %c0_18 = arith.constant 0 : index
    %34 = vector.load %arg3[%33, %c0_17, %c0_18] : memref<8x1x128xf32, #tpu.memory_space<vmem>>, vector<1x1x128xf32>
    %35 = vector.shape_cast %34 : vector<1x1x128xf32> to vector<1x128xf32>
    %36 = arith.subf %25, %35 : vector<1x128xf32>
    %37 = arith.mulf %32, %36 : vector<1x128xf32>
    %38 = arith.addf %35, %37 : vector<1x128xf32>
    %39 = arith.index_cast %c2_i32 : i32 to index
    %c0_19 = arith.constant 0 : index
    %c0_20 = arith.constant 0 : index
    %40 = vector.load %arg4[%39, %c0_19, %c0_20] : memref<8x1x128xf32, #tpu.memory_space<vmem>>, vector<1x1x128xf32>
    %41 = vector.shape_cast %40 : vector<1x1x128xf32> to vector<1x128xf32>
    %42 = vector.shape_cast %38 : vector<1x128xf32> to vector<1x1x128xf32>
    tpu.vector_store %arg4[%39, %c0_19, %c0_20], %42 {strides = array<i32>} : memref<8x1x128xf32, #tpu.memory_space<vmem>>, vector<1x1x128xf32>,
    %c3_i32 = arith.constant 3 : i32
    %43 = arith.index_cast %c3_i32 : i32 to index
    %c0_21 = arith.constant 0 : index
    %c0_22 = arith.constant 0 : index
    %44 = vector.load %arg2[%43, %c0_21, %c0_22] : memref<8x1x128xf32, #tpu.memory_space<vmem>>, vector<1x1x128xf32>
    %45 = vector.shape_cast %44 : vector<1x1x128xf32> to vector<1x128xf32>
    %46 = arith.index_cast %c3_i32 : i32 to index
    %c0_23 = arith.constant 0 : index
    %c0_24 = arith.constant 0 : index
    %47 = vector.load %arg3[%46, %c0_23, %c0_24] : memref<8x1x128xf32, #tpu.memory_space<vmem>>, vector<1x1x128xf32>
    %48 = vector.shape_cast %47 : vector<1x1x128xf32> to vector<1x128xf32>
    %49 = arith.subf %38, %48 : vector<1x128xf32>
    %50 = arith.mulf %45, %49 : vector<1x128xf32>
    %51 = arith.addf %48, %50 : vector<1x128xf32>
    %52 = arith.index_cast %c3_i32 : i32 to index
    %c0_25 = arith.constant 0 : index
    %c0_26 = arith.constant 0 : index
    %53 = vector.load %arg4[%52, %c0_25, %c0_26] : memref<8x1x128xf32, #tpu.memory_space<vmem>>, vector<1x1x128xf32>
    %54 = vector.shape_cast %53 : vector<1x1x128xf32> to vector<1x128xf32>
    %55 = vector.shape_cast %51 : vector<1x128xf32> to vector<1x1x128xf32>
    tpu.vector_store %arg4[%52, %c0_25, %c0_26], %55 {strides = array<i32>} : memref<8x1x128xf32, #tpu.memory_space<vmem>>, vector<1x1x128xf32>,
    %c4_i32 = arith.constant 4 : i32
    %56 = arith.index_cast %c4_i32 : i32 to index
    %c0_27 = arith.constant 0 : index
    %c0_28 = arith.constant 0 : index
    %57 = vector.load %arg2[%56, %c0_27, %c0_28] : memref<8x1x128xf32, #tpu.memory_space<vmem>>, vector<1x1x128xf32>
    %58 = vector.shape_cast %57 : vector<1x1x128xf32> to vector<1x128xf32>
    %59 = arith.index_cast %c4_i32 : i32 to index
    %c0_29 = arith.constant 0 : index
    %c0_30 = arith.constant 0 : index
    %60 = vector.load %arg3[%59, %c0_29, %c0_30] : memref<8x1x128xf32, #tpu.memory_space<vmem>>, vector<1x1x128xf32>
    %61 = vector.shape_cast %60 : vector<1x1x128xf32> to vector<1x128xf32>
    %62 = arith.subf %51, %61 : vector<1x128xf32>
    %63 = arith.mulf %58, %62 : vector<1x128xf32>
    %64 = arith.addf %61, %63 : vector<1x128xf32>
    %65 = arith.index_cast %c4_i32 : i32 to index
    %c0_31 = arith.constant 0 : index
    %c0_32 = arith.constant 0 : index
    %66 = vector.load %arg4[%65, %c0_31, %c0_32] : memref<8x1x128xf32, #tpu.memory_space<vmem>>, vector<1x1x128xf32>
    %67 = vector.shape_cast %66 : vector<1x1x128xf32> to vector<1x128xf32>
    %68 = vector.shape_cast %64 : vector<1x128xf32> to vector<1x1x128xf32>
    tpu.vector_store %arg4[%65, %c0_31, %c0_32], %68 {strides = array<i32>} : memref<8x1x128xf32, #tpu.memory_space<vmem>>, vector<1x1x128xf32>,
    %c5_i32 = arith.constant 5 : i32
    %69 = arith.index_cast %c5_i32 : i32 to index
    %c0_33 = arith.constant 0 : index
    %c0_34 = arith.constant 0 : index
    %70 = vector.load %arg2[%69, %c0_33, %c0_34] : memref<8x1x128xf32, #tpu.memory_space<vmem>>, vector<1x1x128xf32>
    %71 = vector.shape_cast %70 : vector<1x1x128xf32> to vector<1x128xf32>
    %72 = arith.index_cast %c5_i32 : i32 to index
    %c0_35 = arith.constant 0 : index
    %c0_36 = arith.constant 0 : index
    %73 = vector.load %arg3[%72, %c0_35, %c0_36] : memref<8x1x128xf32, #tpu.memory_space<vmem>>, vector<1x1x128xf32>
    %74 = vector.shape_cast %73 : vector<1x1x128xf32> to vector<1x128xf32>
    %75 = arith.subf %64, %74 : vector<1x128xf32>
    %76 = arith.mulf %71, %75 : vector<1x128xf32>
    %77 = arith.addf %74, %76 : vector<1x128xf32>
    %78 = arith.index_cast %c5_i32 : i32 to index
    %c0_37 = arith.constant 0 : index
    %c0_38 = arith.constant 0 : index
    %79 = vector.load %arg4[%78, %c0_37, %c0_38] : memref<8x1x128xf32, #tpu.memory_space<vmem>>, vector<1x1x128xf32>
    %80 = vector.shape_cast %79 : vector<1x1x128xf32> to vector<1x128xf32>
    %81 = vector.shape_cast %77 : vector<1x128xf32> to vector<1x1x128xf32>
    tpu.vector_store %arg4[%78, %c0_37, %c0_38], %81 {strides = array<i32>} : memref<8x1x128xf32, #tpu.memory_space<vmem>>, vector<1x1x128xf32>,
    %c6_i32 = arith.constant 6 : i32
    %82 = arith.index_cast %c6_i32 : i32 to index
    %c0_39 = arith.constant 0 : index
    %c0_40 = arith.constant 0 : index
    %83 = vector.load %arg2[%82, %c0_39, %c0_40] : memref<8x1x128xf32, #tpu.memory_space<vmem>>, vector<1x1x128xf32>
    %84 = vector.shape_cast %83 : vector<1x1x128xf32> to vector<1x128xf32>
    %85 = arith.index_cast %c6_i32 : i32 to index
    %c0_41 = arith.constant 0 : index
    %c0_42 = arith.constant 0 : index
    %86 = vector.load %arg3[%85, %c0_41, %c0_42] : memref<8x1x128xf32, #tpu.memory_space<vmem>>, vector<1x1x128xf32>
    %87 = vector.shape_cast %86 : vector<1x1x128xf32> to vector<1x128xf32>
    %88 = arith.subf %77, %87 : vector<1x128xf32>
    %89 = arith.mulf %84, %88 : vector<1x128xf32>
    %90 = arith.addf %87, %89 : vector<1x128xf32>
    %91 = arith.index_cast %c6_i32 : i32 to index
    %c0_43 = arith.constant 0 : index
    %c0_44 = arith.constant 0 : index
    %92 = vector.load %arg4[%91, %c0_43, %c0_44] : memref<8x1x128xf32, #tpu.memory_space<vmem>>, vector<1x1x128xf32>
    %93 = vector.shape_cast %92 : vector<1x1x128xf32> to vector<1x128xf32>
    %94 = vector.shape_cast %90 : vector<1x128xf32> to vector<1x1x128xf32>
    tpu.vector_store %arg4[%91, %c0_43, %c0_44], %94 {strides = array<i32>} : memref<8x1x128xf32, #tpu.memory_space<vmem>>, vector<1x1x128xf32>,
    %c7_i32 = arith.constant 7 : i32
    %95 = arith.index_cast %c7_i32 : i32 to index
    %c0_45 = arith.constant 0 : index
    %c0_46 = arith.constant 0 : index
    %96 = vector.load %arg2[%95, %c0_45, %c0_46] : memref<8x1x128xf32, #tpu.memory_space<vmem>>, vector<1x1x128xf32>
    %97 = vector.shape_cast %96 : vector<1x1x128xf32> to vector<1x128xf32>
    %98 = arith.index_cast %c7_i32 : i32 to index
    %c0_47 = arith.constant 0 : index
    %c0_48 = arith.constant 0 : index
    %99 = vector.load %arg3[%98, %c0_47, %c0_48] : memref<8x1x128xf32, #tpu.memory_space<vmem>>, vector<1x1x128xf32>
    %100 = vector.shape_cast %99 : vector<1x1x128xf32> to vector<1x128xf32>
    %101 = arith.subf %90, %100 : vector<1x128xf32>
    %102 = arith.mulf %97, %101 : vector<1x128xf32>
    %103 = arith.addf %100, %102 : vector<1x128xf32>
    %104 = arith.index_cast %c7_i32 : i32 to index
    %c0_49 = arith.constant 0 : index
    %c0_50 = arith.constant 0 : index
    %105 = vector.load %arg4[%104, %c0_49, %c0_50] : memref<8x1x128xf32, #tpu.memory_space<vmem>>, vector<1x1x128xf32>
    %106 = vector.shape_cast %105 : vector<1x1x128xf32> to vector<1x128xf32>
    %107 = vector.shape_cast %103 : vector<1x128xf32> to vector<1x1x128xf32>
    tpu.vector_store %arg4[%104, %c0_49, %c0_50], %107 {strides = array<i32>} : memref<8x1x128xf32, #tpu.memory_space<vmem>>, vector<1x1x128xf32>,
    %c8_i32 = arith.constant 8 : i32
    %c0_51 = arith.constant 0 : index
    %c0_52 = arith.constant 0 : index
    %108 = vector.load %arg5[%c0_51, %c0_52] : memref<1x128xf32, #tpu.memory_space<vmem>>, vector<1x128xf32>
    tpu.vector_store %arg5[%c0_51, %c0_52], %103 {strides = array<i32>} : memref<1x128xf32, #tpu.memory_space<vmem>>, vector<1x128xf32>,
    return
  }
  func.func @transform_0(%arg0: i32, %arg1: i32) -> (i32, i32, i32) {
    %c0_i32 = arith.constant 0 : i32
    %c0_i32_0 = arith.constant 0 : i32
    return %arg1, %arg0, %c0_i32 : i32, i32, i32
  }
  func.func @transform_1(%arg0: i32, %arg1: i32) -> (i32, i32, i32) {
    %c0_i32 = arith.constant 0 : i32
    %c0_i32_0 = arith.constant 0 : i32
    return %arg1, %arg0, %c0_i32 : i32, i32, i32
  }
  func.func @transform_2(%arg0: i32, %arg1: i32) -> (i32, i32, i32) {
    %c0_i32 = arith.constant 0 : i32
    %c0_i32_0 = arith.constant 0 : i32
    return %arg1, %arg0, %c0_i32 : i32, i32, i32
  }
}

</mosaic_0001>

<bundles_post_ra>
// kernel: tpu_custom_call.1
= control target key start
LH: loop header
LB: loop body
LE: loop exit
PB: predicated region body
PF: predicated region fallthrough
CT: control target
= control target key end

     0   :  { %7 = vsyncpa [#allocation4], 0  ;;  %s278_s0 = inlined_call_operand.hbm [shape: f32[8,1,128], index: 0, kind: input, shape index: {}]   ;;  %s279_s1 = inlined_call_operand.hbm [shape: f32[8,1,128], index: 1, kind: input, shape index: {}]   ;;  %s280_s2 = inlined_call_operand.hbm [shape: f32[8,1,128], index: 2, kind: output, shape index: {}]  }
   0x1   :  { %8 = vsyncpa [#allocation7], 0 }
   0x2   :  { %9 = vsyncpa [#allocation5], 0  ;;  %s212_s9 = smov [#allocation3]   ;;  %s140_s13 = scalar_lea.hbm %s278_s0, 128 }
   0x3   :  { %s15_s10 = sshll.u32 %s212_s9, 4  ;;  %p141_p0 = scmp.ne.s32.totalorder %s278_s0, %s140_s13  ;;  %s16_s10 = int_to_ptr.vmem [resolvable:$true] %s15_s10 }
   0x4   :  { %p144_p1 = scmp.lt.u32.totalorder %s140_s13, %s278_s0 }
   0x6   :  { %p146_p2 = pnand %p144_p1, %p141_p0 }
   0x8   :  { %149 = shalt.err (!%p146_p2)
}
   0x9   :  { %s150_s18 = scalar_lea.vmem %s16_s10, 128  ;;  %p155_p4 = scmp.lt.s32.totalorder %s16_s10, %s16_s10 }
   0xa   :  { %p151_p3 = scmp.ne.s32.totalorder %s16_s10, %s150_s18  ;;  %p156_p5 = scmp.lt.s32.totalorder %s150_s18, %s150_s18 }
   0xc   :  { %p157_p6 = por %p156_p5, %p155_p4 }
   0xe   :  { %p158_p7 = pnand %p157_p6, %p151_p3 }
  0x10   :  { %161 = shalt.err (!%p158_p7)
}
  0x11   :  { %s213_s19 = smov 16   ;;  %s214_s20 = smov 1  }
  0x12   :  { %21 = dma.hbm_to_vmem [thread:$0]  %s278_s0, 128, %s16_s10, [#allocation4], %s213_s19, %s213_s19, %s214_s20  }
  0x13   :  { %s215_s23 = smov [#allocation6]   ;;  %s162_s27 = scalar_lea.hbm %s279_s1, 128 }
  0x14   :  { %s27_s24 = sshll.u32 %s215_s23, 4  ;;  %p163_p8 = scmp.ne.s32.totalorder %s279_s1, %s162_s27  ;;  %s28_s24 = int_to_ptr.vmem [resolvable:$true] %s27_s24 }
  0x15   :  { %p166_p9 = scmp.lt.u32.totalorder %s162_s27, %s279_s1 }
  0x17   :  { %p168_p10 = pnand %p166_p9, %p163_p8 }
  0x19   :  { %171 = shalt.err (!%p168_p10)
}
  0x1a   :  { %s172_s4 = scalar_lea.vmem %s28_s24, 128  ;;  %p177_p12 = scmp.lt.s32.totalorder %s28_s24, %s28_s24 }
  0x1b   :  { %p173_p11 = scmp.ne.s32.totalorder %s28_s24, %s172_s4  ;;  %p178_p13 = scmp.lt.s32.totalorder %s172_s4, %s172_s4 }
  0x1d   :  { %p179_p0 = por %p178_p13, %p177_p12 }
  0x1f   :  { %p180_p1 = pnand %p179_p0, %p173_p11 }
  0x21   :  { %183 = shalt.err (!%p180_p1)
}
  0x22   :  { %33 = dma.hbm_to_vmem [thread:$0]  %s279_s1, 128, %s28_s24, [#allocation7], %s213_s19, %s213_s19, %s214_s20  }
  0x23   :  { %206 = dma.done.wait [#allocation4], 128  }
  0x24   :  { %207 = vsyncadd [#allocation4], 4294967168 }
  0x25   :  { %208 = dma.done.wait [#allocation7], 128  }
  0x26   :  { %209 = vsyncadd [#allocation7], 4294967168  ;;  %v216_v0 = vmov 0.0   ;;  %v47_v1 = vld [vmem:[#allocation6] sm:$0x1]  ;;  %s217_s1 = smov [#allocation8]  }
  0x27   :  { %44 = vst [vmem:[#allocation2] sm:$0x1] %v216_v0  ;;  %v46_v3 = vld [vmem:[#allocation3] sm:$0x1]  ;;  %v55_v6 = vld [vmem:[#allocation6 + $0x1] sm:$0x1] }
  0x28   :  { %v53_v8 = vld [vmem:[#allocation3 + $0x1] sm:$0x1]  ;;  %v64_v11 = vld [vmem:[#allocation6 + $0x2] sm:$0x1]  ;;  %v62_v13 = vld [vmem:[#allocation3 + $0x2] sm:$0x1] }
  0x29   :  { %v73_v16 = vld [vmem:[#allocation6 + $0x3] sm:$0x1]  ;;  %v71_v18 = vld [vmem:[#allocation3 + $0x3] sm:$0x1]  ;;  %v82_v21 = vld [vmem:[#allocation6 + $0x4] sm:$0x1] }
  0x2a   :  { %v80_v23 = vld [vmem:[#allocation3 + $0x4] sm:$0x1]  ;;  %v91_v26 = vld [vmem:[#allocation6 + $0x5] sm:$0x1]  ;;  %v89_v28 = vld [vmem:[#allocation3 + $0x5] sm:$0x1] }
  0x2b   :  { %v100_v31 = vld [vmem:[#allocation6 + $0x6] sm:$0x1]  ;;  %v98_v33 = vld [vmem:[#allocation3 + $0x6] sm:$0x1]  ;;  %v109_v36 = vld [vmem:[#allocation6 + $0x7] sm:$0x1] }
  0x2c   :  { %v107_v38 = vld [vmem:[#allocation3 + $0x7] sm:$0x1]  ;;  %s121_s6 = sshll.u32 %s217_s1, 4  ;;  %s122_s6 = int_to_ptr.vmem [resolvable:$true] %s121_s6 }
  0x2d   :  { %s184_s7 = scalar_lea.vmem %s122_s6, 128  ;;  %p189_p3 = scmp.lt.s32.totalorder %s122_s6, %s122_s6 }
  0x2e   :  { %v45_v2 = vld [vmem:[#allocation2] sm:$0x1]  ;;  %p185_p2 = scmp.ne.s32.totalorder %s122_s6, %s184_s7  ;;  %p190_p4 = scmp.lt.s32.totalorder %s184_s7, %s184_s7 }
  0x2f   :  { %v48_v4 = vsub.f32 %v45_v2, %v47_v1 }
  0x30   :  { %p191_p5 = por %p190_p4, %p189_p3 }
  0x31   :  { %v49_v5 = vmul.f32 %v48_v4, %v46_v3 }
  0x32   :  { %p192_p6 = pnand %p191_p5, %p185_p2 }
  0x33   :  { %v50_v7 = vadd.f32 %v49_v5, %v47_v1 }
  0x35   :  { %51 = vst [vmem:[#allocation8] sm:$0x1] %v50_v7  ;;  %v56_v9 = vsub.f32 %v50_v7, %v55_v6 }
  0x37   :  { %v57_v10 = vmul.f32 %v56_v9, %v53_v8 }
  0x39   :  { %v58_v12 = vadd.f32 %v57_v10, %v55_v6 }
  0x3b   :  { %60 = vst [vmem:[#allocation8 + $0x1] sm:$0x1] %v58_v12  ;;  %v65_v14 = vsub.f32 %v58_v12, %v64_v11 }
  0x3d   :  { %v66_v15 = vmul.f32 %v65_v14, %v62_v13 }
  0x3f   :  { %v67_v17 = vadd.f32 %v66_v15, %v64_v11 }
  0x41   :  { %69 = vst [vmem:[#allocation8 + $0x2] sm:$0x1] %v67_v17  ;;  %v74_v19 = vsub.f32 %v67_v17, %v73_v16 }
  0x43   :  { %v75_v20 = vmul.f32 %v74_v19, %v71_v18 }
  0x45   :  { %v76_v22 = vadd.f32 %v75_v20, %v73_v16 }
  0x47   :  { %78 = vst [vmem:[#allocation8 + $0x3] sm:$0x1] %v76_v22  ;;  %v83_v24 = vsub.f32 %v76_v22, %v82_v21 }
  0x49   :  { %v84_v25 = vmul.f32 %v83_v24, %v80_v23 }
  0x4b   :  { %v85_v27 = vadd.f32 %v84_v25, %v82_v21 }
  0x4d   :  { %87 = vst [vmem:[#allocation8 + $0x4] sm:$0x1] %v85_v27  ;;  %v92_v29 = vsub.f32 %v85_v27, %v91_v26 }
  0x4f   :  { %v93_v30 = vmul.f32 %v92_v29, %v89_v28 }
  0x51   :  { %v94_v32 = vadd.f32 %v93_v30, %v91_v26 }
  0x53   :  { %96 = vst [vmem:[#allocation8 + $0x5] sm:$0x1] %v94_v32  ;;  %v101_v34 = vsub.f32 %v94_v32, %v100_v31 }
  0x55   :  { %v102_v35 = vmul.f32 %v101_v34, %v98_v33 }
  0x57   :  { %v103_v37 = vadd.f32 %v102_v35, %v100_v31 }
  0x59   :  { %105 = vst [vmem:[#allocation8 + $0x6] sm:$0x1] %v103_v37  ;;  %v110_v39 = vsub.f32 %v103_v37, %v109_v36 }
  0x5b   :  { %v111_v40 = vmul.f32 %v110_v39, %v107_v38 }
  0x5d   :  { %v112_v41 = vadd.f32 %v111_v40, %v109_v36 }
  0x5f   :  { %114 = vst [vmem:[#allocation8 + $0x7] sm:$0x1] %v112_v41  ;;  %115 = vst [vmem:[#allocation2] sm:$0x1] %v112_v41 }
  0x60   :  { %195 = shalt.err (!%p192_p6)
}
  0x61   :  { %s196_s10 = scalar_lea.hbm %s280_s2, 128 }
  0x62   :  { %p197_p7 = scmp.ne.s32.totalorder %s280_s2, %s196_s10  ;;  %p200_p8 = scmp.lt.u32.totalorder %s196_s10, %s280_s2 }
  0x64   :  { %p202_p9 = pnand %p200_p8, %p197_p7 }
  0x66   :  { %205 = shalt.err (!%p202_p9)
}
  0x67   :  { %127 = dma.vmem_to_hbm [thread:$0]  %s122_s6, 128, %s280_s2, [#allocation5], %s213_s19, %s213_s19, %s214_s20  }
  0x68   :  { %210 = dma.done.wait [#allocation5], 128  }
  0x69   :  { %211 = vsyncadd [#allocation5], 4294967168 }
  0x6a   :  { %131 = vsyncpa [#allocation4], 1 }
  0x6b   :  { %132 = vsyncpa [#allocation7], 1 }
  0x6c   :  { %133 = vsyncpa [#allocation5], 1 }

</bundles_post_ra>
